<compile_context>
chip_gen: v5e
topology: v5e:2x2
jax: 0.10.0
libtpu: 0.0.40
codegen_flags: <defaults>
</compile_context>

<pallas_src>
import functools

import jax
import jax.numpy as jnp
from jax.experimental import pallas as pl
from jax.experimental.pallas import tpu as pltpu

EPS = 1e-5
LANES = 128


def _round_up(x: int, m: int) -> int:
    return ((x + m - 1) // m) * m


def _merge_kernel(x_ref, w_ref, b_ref, o_ref, *, feat, mm_dtype):
    """One row tile: complex LayerNorm (affine pre-folded into W/bias) followed
    by the complex Linear expressed as a single real (tm,2D)x(2D,N_pad) matmul."""
    x = x_ref[...].astype(jnp.float32)                     # (tm, 2D): [real|imag]
    tm, two_d = x.shape

    lane = jax.lax.broadcasted_iota(jnp.int32, (tm, two_d), 1)
    is_r = lane < feat                                     # first D lanes = real

    inv_d = jnp.float32(1.0 / feat)
    mu_r = jnp.sum(jnp.where(is_r, x, 0.0), axis=-1, keepdims=True) * inv_d
    mu_i = jnp.sum(jnp.where(is_r, 0.0, x), axis=-1, keepdims=True) * inv_d
    mu = jnp.where(is_r, mu_r, mu_i)                       # per-lane mean

    d = x - mu
    var = jnp.sum(d * d, axis=-1, keepdims=True) * inv_d   # E[|x - mu|^2]
    y = d * jax.lax.rsqrt(var + EPS)                       # [n_real | n_imag]

    # one lane-dense MXU matmul + folded bias row (beta @ W)
    o_ref[...] = (jnp.dot(y.astype(mm_dtype), w_ref[...],
                          preferred_element_type=jnp.float32)
                  + b_ref[...])


def complex_patch_merging(x, w_r, w_i, g_r, g_i, b_r, b_i,
                          scale_factor: int = 2, row_tile: int = 512,
                          mm_dtype=jnp.float32):
    """x: complex64 (B, H, W, C). Returns complex64 (B, H//s, W//s, out_c)."""
    B, H, W, C = x.shape
    s = scale_factor
    h, w = H // s, W // s
    D = C * s * s
    out_c = w_r.shape[1]

    # ---- fold LN affine into the bias-free Linear (exact):
    #      (n*gamma + beta) @ W  ==  n @ (diag(gamma) W)  +  (beta @ W)
    wc = (w_r + 1j * w_i).astype(jnp.complex64)
    gc = (g_r + 1j * g_i).astype(jnp.complex64)
    bc = (b_r + 1j * b_i).astype(jnp.complex64)
    wf = gc[:, None] * wc                                  # (D, out_c) complex
    bias = bc @ wc                                         # (out_c,) complex

    # ---- real block form of the complex matmul, lane-padded to 128 ----------
    n_out = 2 * out_c
    n_pad = _round_up(n_out, LANES)
    ar, ai = jnp.real(wf), jnp.imag(wf)
    w_blk = jnp.zeros((2 * D, n_pad), jnp.float32)
    w_blk = w_blk.at[:D, :out_c].set(ar)
    w_blk = w_blk.at[:D, out_c:n_out].set(ai)
    w_blk = w_blk.at[D:, :out_c].set(-ai)
    w_blk = w_blk.at[D:, out_c:n_out].set(ar)
    w_blk = w_blk.astype(mm_dtype)
    b_row = jnp.zeros((1, n_pad), jnp.float32)
    b_row = b_row.at[0, :out_c].set(jnp.real(bias))
    b_row = b_row.at[0, out_c:n_out].set(jnp.imag(bias))

    # ---- rearrange + complex de-interleave (single fused XLA pass under jit)
    def rearr(a):
        a = a.reshape(B, h, s, w, s, C)
        a = a.transpose(0, 1, 3, 5, 2, 4)                  # b h w c s_h s_w
        return a.reshape(B * h * w, D)

    x2 = jnp.concatenate([rearr(jnp.real(x)).astype(jnp.float32),
                          rearr(jnp.imag(x)).astype(jnp.float32)], axis=-1)

    # ---- tiling: big row tiles, but keep >= 2 grid steps (v7x megacore) -----
    M = B * h * w
    tm = min(row_tile, max(8, _round_up(pl.cdiv(M, 2), 8)))
    grid_m = pl.cdiv(M, tm)
    m_pad = grid_m * tm
    if m_pad != M:
        x2 = jnp.pad(x2, ((0, m_pad - M), (0, 0)))         # zero edge rows

    kernel = functools.partial(_merge_kernel, feat=D, mm_dtype=mm_dtype)
    out = pl.pallas_call(
        kernel,
        out_shape=jax.ShapeDtypeStruct((m_pad, n_pad), jnp.float32),
        grid_spec=pltpu.PrefetchScalarGridSpec(
            num_scalar_prefetch=0,
            grid=(grid_m,),
            in_specs=[pl.BlockSpec((tm, 2 * D), lambda i: (i, 0)),
                      pl.BlockSpec((2 * D, n_pad), lambda i: (0, 0)),
                      pl.BlockSpec((1, n_pad), lambda i: (0, 0))],
            out_specs=pl.BlockSpec((tm, n_pad), lambda i: (i, 0)),
        ),
        compiler_params=pltpu.CompilerParams(
            dimension_semantics=("parallel",),
            vmem_limit_bytes=48 * 1024 * 1024),
    )(x2, w_blk, b_row)

    o = out[:M]
    res = jax.lax.complex(o[:, :out_c], o[:, out_c:n_out]).astype(jnp.complex64)
    return res.reshape(B, h, w, out_c)


def _reference(x, w_r, w_i, g_r, g_i, b_r, b_i, scale_factor=2):
    """Pure-JAX reference of the module semantics (for validation)."""
    B, H, W, C = x.shape
    s = scale_factor
    h, w = H // s, W // s
    D = C * s * s
    a = x.reshape(B, h, s, w, s, C).transpose(0, 1, 3, 5, 2, 4).reshape(B, h * w, D)
    mu = jnp.mean(a, axis=-1, keepdims=True)
    d = a - mu
    var = jnp.mean(jnp.abs(d) ** 2, axis=-1, keepdims=True)
    n = d / jnp.sqrt(var + EPS)
    gamma = (g_r + 1j * g_i).astype(jnp.complex64)
    beta = (b_r + 1j * b_i).astype(jnp.complex64)
    y = n * gamma + beta
    wmat = (w_r + 1j * w_i).astype(jnp.complex64)
    out = y @ wmat
    return out.reshape(B, h, w, -1)


if __name__ == "__main__":
    key = jax.random.PRNGKey(0)
    B, H, W, C = 2, 16, 16, 4               # small shapes consistent with the module
    out_channels, scale = 8, 2
    D = scale * scale * C

    k1, k2, k3, k4, k5, k6, k7, k8 = jax.random.split(key, 8)
    x = (jax.random.normal(k1, (B, H, W, C), jnp.float32)
         + 1j * jax.random.normal(k2, (B, H, W, C), jnp.float32)).astype(jnp.complex64)

    # ComplexLinear weight (in, out), no bias.
    w_r = jax.random.normal(k3, (D, out_channels), jnp.float32) * (1.0 / D) ** 0.5
    w_i = jax.random.normal(k4, (D, out_channels), jnp.float32) * (1.0 / D) ** 0.5
    # Non-trivial ComplexLayerNorm affine params (exercises the weight fold).
    g_r = 1.0 + 0.1 * jax.random.normal(k5, (D,), jnp.float32)
    g_i = 0.1 * jax.random.normal(k6, (D,), jnp.float32)
    b_r = 0.1 * jax.random.normal(k7, (D,), jnp.float32)
    b_i = 0.1 * jax.random.normal(k8, (D,), jnp.float32)

    fwd = jax.jit(functools.partial(complex_patch_merging, scale_factor=scale))
    out = jax.block_until_ready(fwd(x, w_r, w_i, g_r, g_i, b_r, b_i))

    ref = _reference(x, w_r, w_i, g_r, g_i, b_r, b_i, scale_factor=scale)
    assert out.shape == (B, H // scale, W // scale, out_channels)
    assert jnp.allclose(out, ref, atol=2e-4, rtol=2e-4)

    print("KERNEL_OK")
</pallas_src>

<mosaic_0001>
module attributes {stable_mosaic.version = 11 : i64} {
  func.func @_merge_kernel(%arg0: i32, %arg1: memref<64x32xf32, #tpu.memory_space<vmem>>, %arg2: memref<32x128xf32, #tpu.memory_space<vmem>>, %arg3: memref<1x128xf32, #tpu.memory_space<vmem>>, %arg4: memref<64x128xf32, #tpu.memory_space<vmem>>) attributes {dimension_semantics = [#tpu.dimension_semantics<parallel>], iteration_bounds = array<i64: 2>, scalar_prefetch = 0 : i64, scratch_operands = 0 : i64, tpu.core_type = #tpu.core_type<tc>, window_params = [{transform_indices = @transform_0, window_bounds = array<i64: 64, 32>}, {pipeline_mode = #tpu.pipeline_mode<synchronous>, transform_indices = @transform_1, window_bounds = array<i64: 32, 128>}, {pipeline_mode = #tpu.pipeline_mode<synchronous>, transform_indices = @transform_2, window_bounds = array<i64: 1, 128>}, {transform_indices = @transform_3, window_bounds = array<i64: 64, 128>}]} {
    %c0 = arith.constant 0 : index
    %c0_0 = arith.constant 0 : index
    %0 = vector.load %arg1[%c0, %c0_0] : memref<64x32xf32, #tpu.memory_space<vmem>>, vector<64x32xf32>
    %1 = tpu.iota {dimensions = array<i32: 1>} : vector<64x32xi32>
    %c16_i32 = arith.constant 16 : i32
    %2 = vector.broadcast %c16_i32 : i32 to vector<64x32xi32>
    %3 = arith.cmpi slt, %1, %2 : vector<64x32xi32>
    %cst = arith.constant 0.000000e+00 : f32
    %4 = vector.broadcast %cst : f32 to vector<64x32xf32>
    %5 = arith.select %3, %0, %4 : vector<64x32xi1>, vector<64x32xf32>
    %cst_1 = arith.constant dense<0.000000e+00> : vector<64xf32>
    %6 = vector.multi_reduction <add>, %5, %cst_1 [1] : vector<64x32xf32> to vector<64xf32>
    %7 = vector.shape_cast %6 : vector<64xf32> to vector<64x1xf32>
    %cst_2 = arith.constant 6.250000e-02 : f32
    %8 = vector.broadcast %cst_2 : f32 to vector<64x1xf32>
    %9 = arith.mulf %7, %8 : vector<64x1xf32>
    %cst_3 = arith.constant 0.000000e+00 : f32
    %10 = vector.broadcast %cst_3 : f32 to vector<64x32xf32>
    %11 = arith.select %3, %10, %0 : vector<64x32xi1>, vector<64x32xf32>
    %cst_4 = arith.constant dense<0.000000e+00> : vector<64xf32>
    %12 = vector.multi_reduction <add>, %11, %cst_4 [1] : vector<64x32xf32> to vector<64xf32>
    %13 = vector.shape_cast %12 : vector<64xf32> to vector<64x1xf32>
    %cst_5 = arith.constant 6.250000e-02 : f32
    %14 = vector.broadcast %cst_5 : f32 to vector<64x1xf32>
    %15 = arith.mulf %13, %14 : vector<64x1xf32>
    %16 = vector.shape_cast %9 : vector<64x1xf32> to vector<64x1xf32>
    %17 = vector.broadcast %16 : vector<64x1xf32> to vector<64x32xf32>
    %18 = vector.shape_cast %15 : vector<64x1xf32> to vector<64x1xf32>
    %19 = vector.broadcast %18 : vector<64x1xf32> to vector<64x32xf32>
    %20 = arith.select %3, %17, %19 : vector<64x32xi1>, vector<64x32xf32>
    %21 = arith.subf %0, %20 : vector<64x32xf32>
    %22 = arith.mulf %21, %21 : vector<64x32xf32>
    %cst_6 = arith.constant dense<0.000000e+00> : vector<64xf32>
    %23 = vector.multi_reduction <add>, %22, %cst_6 [1] : vector<64x32xf32> to vector<64xf32>
    %24 = vector.shape_cast %23 : vector<64xf32> to vector<64x1xf32>
    %cst_7 = arith.constant 6.250000e-02 : f32
    %25 = vector.broadcast %cst_7 : f32 to vector<64x1xf32>
    %26 = arith.mulf %24, %25 : vector<64x1xf32>
    %cst_8 = arith.constant 9.99999974E-6 : f32
    %27 = vector.broadcast %cst_8 : f32 to vector<64x1xf32>
    %28 = arith.addf %26, %27 : vector<64x1xf32>
    %29 = math.rsqrt %28 : vector<64x1xf32>
    %30 = vector.broadcast %29 : vector<64x1xf32> to vector<64x32xf32>
    %31 = arith.mulf %21, %30 : vector<64x32xf32>
    %c0_9 = arith.constant 0 : index
    %c0_10 = arith.constant 0 : index
    %32 = vector.load %arg2[%c0_9, %c0_10] : memref<32x128xf32, #tpu.memory_space<vmem>>, vector<32x128xf32>
    %cst_11 = arith.constant dense<0.000000e+00> : vector<64x128xf32>
    %33 = tpu.matmul %31, %32, %cst_11 {dimension_numbers = #tpu.dot_dimension_numbers<[1], [0], [0], [1], [0, 0, 1, 1], [], []>} : vector<64x32xf32>, vector<32x128xf32>, vector<64x128xf32> -> vector<64x128xf32>
    %c0_12 = arith.constant 0 : index
    %c0_13 = arith.constant 0 : index
    %34 = vector.load %arg3[%c0_12, %c0_13] : memref<1x128xf32, #tpu.memory_space<vmem>>, vector<1x128xf32>
    %35 = vector.broadcast %34 : vector<1x128xf32> to vector<64x128xf32>
    %36 = arith.addf %33, %35 : vector<64x128xf32>
    %c0_14 = arith.constant 0 : index
    %c0_15 = arith.constant 0 : index
    %37 = vector.load %arg4[%c0_14, %c0_15] : memref<64x128xf32, #tpu.memory_space<vmem>>, vector<64x128xf32>
    tpu.vector_store %arg4[%c0_14, %c0_15], %36 {strides = array<i32>} : memref<64x128xf32, #tpu.memory_space<vmem>>, vector<64x128xf32>,
    return
  }
  func.func @transform_0(%arg0: i32) -> (i32, i32) {
    %c0_i32 = arith.constant 0 : i32
    %c0_i32_0 = arith.constant 0 : i32
    return %arg0, %c0_i32 : i32, i32
  }
  func.func @transform_1(%arg0: i32) -> (i32, i32) {
    %c0_i32 = arith.constant 0 : i32
    %c0_i32_0 = arith.constant 0 : i32
    %c0_i32_1 = arith.constant 0 : i32
    return %c0_i32, %c0_i32_0 : i32, i32
  }
  func.func @transform_2(%arg0: i32) -> (i32, i32) {
    %c0_i32 = arith.constant 0 : i32
    %c0_i32_0 = arith.constant 0 : i32
    %c0_i32_1 = arith.constant 0 : i32
    return %c0_i32, %c0_i32_0 : i32, i32
  }
  func.func @transform_3(%arg0: i32) -> (i32, i32) {
    %c0_i32 = arith.constant 0 : i32
    %c0_i32_0 = arith.constant 0 : i32
    return %arg0, %c0_i32 : i32, i32
  }
}

</mosaic_0001>

<bundles_post_ra>
// kernel: custom-call.1
= control target key start
LH: loop header
LB: loop body
LE: loop exit
PB: predicated region body
PF: predicated region fallthrough
CT: control target
= control target key end

     0   :  { %s56_s0 = inlined_call_operand.hbm [shape: c64[2,16,16,4], index: 0, kind: input, shape index: {}]   ;;  %s57_s1 = inlined_call_operand.vmem [shape: f32[2,16,16,4], index: 1, kind: output, shape index: {}]  }
   0x1   :  { %s2_s8 = scalar_lea.hbm %s56_s0, 128 }
   0x2   :  { %3 = vsyncpa [#allocation0], 0  ;;  %s5_s9 = sshll.u32 %s2_s8, 4  ;;  %s7_s12 = sshll.u32 %s57_s1, 4  ;;  %s6_s9 = int_to_ptr.hbm [resolvable:$true] %s5_s9  ;;  %s8_s12 = int_to_ptr.vmem [resolvable:$true] %s7_s12 }
   0x3   :  { %10 = dma.hbm_to_vmem [thread:$0]  %s6_s9, 2048, %s8_s12, [#allocation0] }
   0x4   :  { %38 = dma.done.wait [#allocation0], 2048  }
   0x5   :  { %39 = vsyncadd [#allocation0], 4294965248 }
   0x6   :  { %13 = vsyncpa [#allocation0], 1 }

// kernel: custom-call
= control target key start
LH: loop header
LB: loop body
LE: loop exit
PB: predicated region body
PF: predicated region fallthrough
CT: control target
= control target key end

     0   :  { %2 = vsyncpa [#allocation0], 0  ;;  %s55_s0 = inlined_call_operand.hbm [shape: c64[2,16,16,4], index: 0, kind: input, shape index: {}]   ;;  %s56_s1 = inlined_call_operand.vmem [shape: f32[2,16,16,4], index: 1, kind: output, shape index: {}]  }
   0x1   :  { %s4_s8 = sshll.u32 %s55_s0, 4  ;;  %s6_s11 = sshll.u32 %s56_s1, 4  ;;  %s5_s8 = int_to_ptr.hbm [resolvable:$true] %s4_s8  ;;  %s7_s11 = int_to_ptr.vmem [resolvable:$true] %s6_s11 }
   0x2   :  { %9 = dma.hbm_to_vmem [thread:$0]  %s5_s8, 2048, %s7_s11, [#allocation0] }
   0x3   :  { %37 = dma.done.wait [#allocation0], 2048  }
   0x4   :  { %38 = vsyncadd [#allocation0], 4294965248 }
   0x5   :  { %12 = vsyncpa [#allocation0], 1 }

// kernel: custom-call.2
= control target key start
LH: loop header
LB: loop body
LE: loop exit
PB: predicated region body
PF: predicated region fallthrough
CT: control target
= control target key end

     0   :  { %s105_s0 = inlined_call_operand.vmem [shape: f32[2,8,8,8], index: 0, kind: input, shape index: {}]   ;;  %s106_s1 = inlined_call_operand.vmem [shape: f32[2,8,8,8], index: 1, kind: input, shape index: {}]   ;;  %s107_s2 = inlined_call_operand.hbm [shape: c64[2,8,8,8], index: 2, kind: output, shape index: {}]  }
   0x1   :  { %s3_s11 = scalar_lea.hbm %s107_s2, 128 }
   0x2   :  { %4 = vsyncpa [#allocation0], 0  ;;  %s6_s14 = sshll.u32 %s105_s0, 4  ;;  %s8_s17 = sshll.u32 %s107_s2, 4  ;;  %s7_s14 = int_to_ptr.vmem [resolvable:$true] %s6_s14  ;;  %s9_s17 = int_to_ptr.hbm [resolvable:$true] %s8_s17 }
   0x3   :  { %11 = dma.vmem_to_hbm [thread:$0]  %s7_s14, 2048, %s9_s17, [#allocation0] }
   0x4   :  { %74 = dma.done.wait [#allocation0], 2048  }
   0x5   :  { %75 = vsyncadd [#allocation0], 4294965248 }
   0x6   :  { %14 = vsyncpa [#allocation0], 1 }
   0x7   :  { %15 = vsyncpa [#allocation1], 0  ;;  %s17_s20 = sshll.u32 %s106_s1, 4  ;;  %s19_s21 = sshll.u32 %s3_s11, 4  ;;  %s18_s20 = int_to_ptr.vmem [resolvable:$true] %s17_s20  ;;  %s20_s21 = int_to_ptr.hbm [resolvable:$true] %s19_s21 }
   0x8   :  { %22 = dma.vmem_to_hbm [thread:$0]  %s18_s20, 2048, %s20_s21, [#allocation1] }
   0x9   :  { %76 = dma.done.wait [#allocation1], 2048  }
   0xa   :  { %77 = vsyncadd [#allocation1], 4294965248 }
   0xb   :  { %25 = vsyncpa [#allocation1], 1 }

// kernel: complex_patch_merging.1
= control target key start
LH: loop header
LB: loop body
LE: loop exit
PB: predicated region body
PF: predicated region fallthrough
CT: control target
= control target key end

     0   :  { %s639_s12 = smov 0   ;;  %s851_s0 = inlined_call_operand.vmem [shape: f32[128,32], index: 0, kind: input, shape index: {}]   ;;  %s852_s1 = inlined_call_operand.vmem [shape: f32[32,128], index: 1, kind: input, shape index: {}]   ;;  %s853_s2 = inlined_call_operand.vmem [shape: f32[1,128], index: 2, kind: input, shape index: {}]   ;;  %s854_s3 = inlined_call_operand.vmem [shape: f32[128,128], index: 3, kind: output, shape index: {}]  }
   0x1 LB: > { %s555_s13 = sadd.s32 4294967295, %s617_s12   ;;  %p559_p0 = scmp.ge.s32.totalorder %s617_s12, 1  ;;  %s617_s12 = sphi %s639_s12, %s13_s12  }
   0x2   : > { %p138_p1 = scmp.lt.s32.totalorder %s617_s12, 3 }
   0x4   : > { %p139_p2 = pnand %p559_p0, %p138_p1 }
   0x5   : > { %s560_s14 = sshll.u32 (!%p139_p2), %s555_s13, 3 }
   0x6   : > { %142 = sbr.rel (%p139_p2) target bundleno = 451 (0x1c3), region = 32  ;;  %p163_p3 = scmp.lt.s32.totalorder (!%p139_p2), %s560_s14, 15 }
   0xb   : > { %v182_v0 = vlaneseq  ;;  %s856_s14 = smov (!%p163_p3, %s560_s14), 15  ;;  %vm193_vm1 = vcmask 261120  }
   0xc   : > { %s561_s15 = sshll.u32 %s856_s14, 3 }
   0xd   : > { %v647_v1 = vand.u32 127, %v182_v0  ;;  %s658_s18 = scalar_lea.vmem %s851_s0, %s561_s15  ;;  %s172_s4 = scalar_lea.vmem %s854_s3, %s561_s15 }
   0xe   : > { %v661_v2 = vld [vmem:[%s658_s18 + $0x20] sm:$0xff]  ;;  %v679_v10 = vld [vmem:[%s658_s18 + $0x30] sm:$0xff]  ;;  %v697_v18 = vld [vmem:[%s658_s18 + $0x28] sm:$0xff] }
   0xf   : > { %vm184_vm0 = vcmp.lt.s32.totalorder %v647_v1, 16  ;;  %v664_v3 = vld [vmem:[%s658_s18] sm:$0xff]  ;;  %v682_v11 = vld [vmem:[%s658_s18 + $0x10] sm:$0xff]  ;;  %v712_v25 = vld [vmem:[%s658_s18 + $0x38] sm:$0xff] }
  0x10   : > { %v230_v4 = vsel %vm184_vm0, 0.0, %v661_v2  ;;  %v189_v5 = vsel %vm184_vm0, %v661_v2, 0.0  ;;  %v185_v6 = vsel %vm184_vm0, %v664_v3, 0.0  ;;  %v232_v12 = vsel %vm184_vm0, 0.0, %v679_v10  ;;  %v727_v32 = vld [vmem:[%s658_s18 + $0x8] sm:$0xff]  ;;  %v730_v33 = vld [vmem:[%s658_s18 + $0x18] sm:$0xff] }
  0x11   : > { %v246_v7 = vsel %vm193_vm1, %v230_v4, 0.0  ;;  %v206_v8 = vsel %vm193_vm1, %v189_v5, 0.0  ;;  %v194_v9 = vsel %vm193_vm1, %v185_v6, 0.0  ;;  %v191_v13 = vsel %vm184_vm0, %v679_v10, 0.0  ;;  %v420_v1 = vld [vmem:[%s852_s1 + $0x10] sm:$0xff] }
  0x12   : > { %247 = vadd.xlane.f32.xlu1 %v246_v7  ;;  %207 = vadd.xlane.f32.xlu0 %v206_v8  ;;  %v187_v14 = vsel %vm184_vm0, %v682_v11, 0.0  ;;  %v252_v15 = vsel %vm193_vm1, %v232_v12, 0.0  ;;  %v212_v16 = vsel %vm193_vm1, %v191_v13, 0.0  ;;  %v228_v19 = vsel %vm184_vm0, 0.0, %v682_v11 }
  0x13   : > { %195 = vadd.xlane.f32.xlu2 %v194_v9  ;;  %v200_v17 = vsel %vm193_vm1, %v187_v14, 0.0  ;;  %v226_v20 = vsel %vm184_vm0, 0.0, %v664_v3  ;;  %v190_v21 = vsel %vm184_vm0, %v697_v18, 0.0  ;;  %v240_v22 = vsel %vm193_vm1, %v228_v19, 0.0 }
  0x14   : > { %v234_v23 = vsel %vm193_vm1, %v226_v20, 0.0  ;;  %v209_v24 = vsel %vm193_vm1, %v190_v21, 0.0  ;;  %v231_v26 = vsel %vm184_vm0, 0.0, %v697_v18  ;;  %v192_v27 = vsel %vm184_vm0, %v712_v25, 0.0 }
  0x15   : > { %v233_v28 = vsel %vm184_vm0, 0.0, %v712_v25  ;;  %v249_v29 = vsel %vm193_vm1, %v231_v26, 0.0  ;;  %v215_v30 = vsel %vm193_vm1, %v192_v27, 0.0  ;;  %v186_v34 = vsel %vm184_vm0, %v727_v32, 0.0 }
  0x16   : > { %v255_v31 = vsel %vm193_vm1, %v233_v28, 0.0  ;;  %v188_v35 = vsel %vm184_vm0, %v730_v33, 0.0  ;;  %v227_v36 = vsel %vm184_vm0, 0.0, %v727_v32  ;;  %v197_v37 = vsel %vm193_vm1, %v186_v34, 0.0 }
  0x17   : > { %v203_v38 = vsel %vm193_vm1, %v188_v35, 0.0  ;;  %v237_v39 = vsel %vm193_vm1, %v227_v36, 0.0  ;;  %v229_v40 = vsel %vm184_vm0, 0.0, %v730_v33 }
  0x18   : > { %v243_v41 = vsel %vm193_vm1, %v229_v40, 0.0 }
  0x1a   : > { %253 = vadd.xlane.f32.xlu1 %v252_v15  ;;  %213 = vadd.xlane.f32.xlu0 %v212_v16 }
  0x1b   : > { %201 = vadd.xlane.f32.xlu2 %v200_v17 }
  0x22   : > { %241 = vadd.xlane.f32.xlu1 %v240_v22  ;;  %235 = vadd.xlane.f32.xlu0 %v234_v23 }
  0x23   : > { %210 = vadd.xlane.f32.xlu2 %v209_v24 }
  0x2a   : > { %250 = vadd.xlane.f32.xlu1 %v249_v29  ;;  %216 = vadd.xlane.f32.xlu0 %v215_v30 }
  0x2b   : > { %256 = vadd.xlane.f32.xlu2 %v255_v31 }
  0x32   : > { %198 = vadd.xlane.f32.xlu0 %v197_v37  ;;  %204 = vadd.xlane.f32.xlu1 %v203_v38 }
  0x33   : > { %238 = vadd.xlane.f32.xlu2 %v237_v39 }
  0x3a   : > { %244 = vadd.xlane.f32.xlu0 %v243_v41 }
  0x85   : > { %v248_v42 = vpop.xlane.xlu1 %247  ;;  %v208_v43 = vpop.xlane.xlu0 %207 }
  0x86   : > { %v262_v44 = vmul.f32 0.0625, %v248_v42  ;;  %v222_v45 = vmul.f32 0.0625, %v208_v43  ;;  %v196_v46 = vpop.xlane.xlu2 %195 }
  0x87   : > { %v218_v63 = vmul.f32 0.0625, %v196_v46 }
  0x88   : > { %v270_v47 = vsel %vm184_vm0, %v222_v45, %v262_v44  ;;  %v421_v44 = vld [vmem:[%s852_s1 + $0x18] sm:$0xff]  ;;  %v418_v45 = vld [vmem:[%s852_s1] sm:$0xff] }
  0x89   : > { %v751_v48 = vsub.f32 %v661_v2, %v270_v47  ;;  %575 = vmatpush.msra.mxu2 %v421_v44  ;;  %576 = vmatpush.msra.mxu3 %v421_v44 }
  0x8a   : > { %462 = vmatpush.msra.mxu0 %v421_v44  ;;  %574 = vmatpush.msra.mxu1 %v421_v44 }
  0x8b   : > { %v286_v49 = vmul.f32 %v751_v48, %v751_v48  ;;  %578 = vmatpush.msra.mxu2 %v420_v1  ;;  %579 = vmatpush.msra.mxu3 %v420_v1 }
  0x8c   : > { %463 = vmatpush.msra.mxu0 %v420_v1  ;;  %577 = vmatpush.msra.mxu1 %v420_v1 }
  0x8d   : > { %v254_v50 = vpop.xlane.xlu1 %253  ;;  %v214_v51 = vpop.xlane.xlu0 %213  ;;  %v302_v52 = vsel %vm193_vm1, %v286_v49, 0.0 }
  0x8e   : > { %v264_v53 = vmul.f32 0.0625, %v254_v50  ;;  %v224_v54 = vmul.f32 0.0625, %v214_v51  ;;  %v202_v55 = vpop.xlane.xlu2 %201  ;;  %303 = vadd.xlane.f32.xlu1 %v302_v52 }
  0x8f   : > { %v220_v59 = vmul.f32 0.0625, %v202_v55 }
  0x90   : > { %v272_v56 = vsel %vm184_vm0, %v224_v54, %v264_v53 }
  0x91   : > { %v759_v57 = vsub.f32 %v679_v10, %v272_v56 }
  0x93   : > { %v288_v58 = vmul.f32 %v759_v57, %v759_v57 }
  0x95   : > { %v242_v60 = vpop.xlane.xlu1 %241  ;;  %v236_v61 = vpop.xlane.xlu0 %235  ;;  %v308_v62 = vsel %vm193_vm1, %v288_v58, 0.0 }
  0x96   : > { %v260_v0 = vmul.f32 0.0625, %v242_v60  ;;  %v258_v2 = vmul.f32 0.0625, %v236_v61  ;;  %v211_v4 = vpop.xlane.xlu2 %210  ;;  %309 = vadd.xlane.f32.xlu2 %v308_v62 }
  0x97   : > { %v223_v12 = vmul.f32 0.0625, %v211_v4 }
  0x98   : > { %v268_v5 = vsel %vm184_vm0, %v220_v59, %v260_v0  ;;  %v266_v6 = vsel %vm184_vm0, %v218_v63, %v258_v2 }
  0x99   : > { %v769_v7 = vsub.f32 %v664_v3, %v266_v6  ;;  %v772_v8 = vsub.f32 %v682_v11, %v268_v5 }
  0x9b   : > { %v282_v9 = vmul.f32 %v769_v7, %v769_v7  ;;  %v284_v10 = vmul.f32 %v772_v8, %v772_v8 }
  0x9d   : > { %v251_v13 = vpop.xlane.xlu1 %250  ;;  %v217_v14 = vpop.xlane.xlu0 %216  ;;  %v290_v15 = vsel %vm193_vm1, %v282_v9, 0.0  ;;  %v296_v16 = vsel %vm193_vm1, %v284_v10, 0.0 }
  0x9e   : > { %v263_v17 = vmul.f32 0.0625, %v251_v13  ;;  %v225_v19 = vmul.f32 0.0625, %v217_v14  ;;  %v257_v3 = vpop.xlane.xlu2 %256  ;;  %291 = vadd.xlane.f32.xlu0 %v290_v15  ;;  %297 = vadd.xlane.f32.xlu1 %v296_v16 }
  0x9f   : > { %v265_v11 = vmul.f32 0.0625, %v257_v3 }
  0xa0   : > { %v271_v20 = vsel %vm184_vm0, %v223_v12, %v263_v17 }
  0xa1   : > { %v273_v21 = vsel %vm184_vm0, %v225_v19, %v265_v11  ;;  %v785_v22 = vsub.f32 %v697_v18, %v271_v20 }
  0xa2   : > { %v788_v23 = vsub.f32 %v712_v25, %v273_v21 }
  0xa3   : > { %v287_v24 = vmul.f32 %v785_v22, %v785_v22 }
  0xa4   : > { %v289_v26 = vmul.f32 %v788_v23, %v788_v23 }
  0xa5   : > { %v199_v27 = vpop.xlane.xlu0 %198  ;;  %v305_v28 = vsel %vm193_vm1, %v287_v24, 0.0  ;;  %v205_v25 = vpop.xlane.xlu1 %204 }
  0xa6   : > { %v219_v29 = vmul.f32 0.0625, %v199_v27  ;;  %v239_v30 = vpop.xlane.xlu2 %238  ;;  %306 = vadd.xlane.f32.xlu2 %v305_v28  ;;  %v311_v31 = vsel %vm193_vm1, %v289_v26, 0.0  ;;  %v221_v36 = vmul.f32 0.0625, %v205_v25 }
  0xa7   : > { %v259_v34 = vmul.f32 0.0625, %v239_v30  ;;  %312 = vadd.xlane.f32.xlu0 %v311_v31 }
  0xa9   : > { %v267_v18 = vsel %vm184_vm0, %v219_v29, %v259_v34 }
  0xaa   : > { %v799_v35 = vsub.f32 %v727_v32, %v267_v18 }
  0xac   : > { %v283_v37 = vmul.f32 %v799_v35, %v799_v35 }
  0xad   : > { %v245_v38 = vpop.xlane.xlu0 %244 }
  0xae   : > { %v261_v39 = vmul.f32 0.0625, %v245_v38  ;;  %v293_v40 = vsel %vm193_vm1, %v283_v37, 0.0 }
  0xaf   : > { %294 = vadd.xlane.f32.xlu1 %v293_v40 }
  0xb0   : > { %v269_v41 = vsel %vm184_vm0, %v221_v36, %v261_v39 }
  0xb1   : > { %v807_v42 = vsub.f32 %v730_v33, %v269_v41  ;;  %v419_v33 = vld [vmem:[%s852_s1 + $0x8] sm:$0xff] }
  0xb2   : > { %581 = vmatpush.msra.mxu2 %v419_v33  ;;  %582 = vmatpush.msra.mxu3 %v419_v33 }
  0xb3   : > { %v285_v43 = vmul.f32 %v807_v42, %v807_v42  ;;  %464 = vmatpush.msra.mxu0 %v419_v33  ;;  %580 = vmatpush.msra.mxu1 %v419_v33 }
  0xb4   : > { %584 = vmatpush.msra.mxu2 %v418_v45  ;;  %585 = vmatpush.msra.mxu3 %v418_v45 }
  0xb5   : > { %v299_v32 = vsel %vm193_vm1, %v285_v43, 0.0  ;;  %465 = vmatpush.msra.mxu0 %v418_v45  ;;  %583 = vmatpush.msra.mxu1 %v418_v45 }
  0xb6   : > { %300 = vadd.xlane.f32.xlu2 %v299_v32 }
 0x101   : > { %v304_v46 = vpop.xlane.xlu1 %303 }
 0x102   : > { %v318_v47 = vmul.f32 0.0625, %v304_v46 }
 0x104   : > { %v326_v49 = vadd.f32 1e-05, %v318_v47 }
 0x106   : > { %595 = vrsqrt.f32 %v326_v49  ;;  %vm376_vm3 = vweird.f32 %v326_v49 }
 0x109   : > { %v310_v50 = vpop.xlane.xlu2 %309 }
 0x10a   : > { %v320_v51 = vmul.f32 0.0625, %v310_v50 }
 0x10c   : > { %v596_v52 = vpop.eup %595  ;;  %v328_v53 = vadd.f32 1e-05, %v320_v51 }
 0x10d   : > { %v371_v54 = vmul.f32 %v596_v52, %v326_v49  ;;  %vm377_vm2 = vweird.f32 %v596_v52 }
 0x10e   : > { %597 = vrsqrt.f32 %v328_v53  ;;  %vm378_vm4 = vmor %vm376_vm3, %vm377_vm2  ;;  %vm396_vm6 = vweird.f32 %v328_v53 }
 0x10f   : > { %v372_v55 = vmul.f32 %v596_v52, %v371_v54 }
 0x111   : > { %v373_v56 = vmul.f32 0.5, %v372_v55  ;;  %v292_v58 = vpop.xlane.xlu0 %291  ;;  %v298_v59 = vpop.xlane.xlu1 %297 }
 0x112   : > { %v314_v60 = vmul.f32 0.0625, %v292_v58  ;;  %v316_v61 = vmul.f32 0.0625, %v298_v59 }
 0x113   : > { %v374_v62 = vsub.f32 1.5, %v373_v56 }
 0x114   : > { %v598_v63 = vpop.eup %597  ;;  %v322_v0 = vadd.f32 1e-05, %v314_v60  ;;  %v324_v2 = vadd.f32 1e-05, %v316_v61 }
 0x115   : > { %v391_v4 = vmul.f32 %v598_v63, %v328_v53  ;;  %v375_v5 = vmul.f32 %v596_v52, %v374_v62  ;;  %vm397_vm5 = vweird.f32 %v598_v63 }
 0x116   : > { %599 = vrsqrt.f32 %v322_v0  ;;  %vm398_vm7 = vmor %vm396_vm6, %vm397_vm5  ;;  %vm336_vm10 = vweird.f32 %v322_v0  ;;  %vm356_vm12 = vweird.f32 %v324_v2 }
 0x117   : > { %v392_v6 = vmul.f32 %v598_v63, %v391_v4  ;;  %601 = vrsqrt.f32 %v324_v2  ;;  %v379_v9 = vsel %vm378_vm4, %v596_v52, %v375_v5 }
 0x118   : > { %v414_v10 = vmul.f32 %v379_v9, %v751_v48 }
 0x119   : > { %v393_v12 = vmul.f32 0.5, %v392_v6  ;;  %v307_v13 = vpop.xlane.xlu2 %306 }
 0x11a   : > { %v313_v14 = vpop.xlane.xlu0 %312  ;;  %v319_v15 = vmul.f32 0.0625, %v307_v13  ;;  %568 = vmatmul.msk.f32.vlgmr.msra.gmra.mxu2 %vm193_vm1, %v414_v10 }
 0x11b   : > { %v394_v16 = vsub.f32 1.5, %v393_v12  ;;  %v321_v17 = vmul.f32 0.0625, %v313_v14 }
 0x11c   : > { %v600_v19 = vpop.eup %599  ;;  %v327_v3 = vadd.f32 1e-05, %v319_v15  ;;  %v594_v15 = vld [vmem:[%s853_s2] ss:$0 sm:$0xff] }
 0x11d   : > { %v602_v11 = vpop.eup %601  ;;  %v331_v20 = vmul.f32 %v600_v19, %v322_v0  ;;  %v329_v21 = vadd.f32 1e-05, %v321_v17  ;;  %v395_v24 = vmul.f32 %v598_v63, %v394_v16  ;;  %vm337_vm8 = vweird.f32 %v600_v19 }
 0x11e   : > { %v351_v26 = vmul.f32 %v602_v11, %v324_v2  ;;  %603 = vrsqrt.f32 %v327_v3  ;;  %vm357_vm9 = vweird.f32 %v602_v11  ;;  %vm338_vm11 = vmor %vm336_vm10, %vm337_vm8  ;;  %vm386_vm0 = vweird.f32 %v327_v3 }
 0x11f   : > { %v332_v48 = vmul.f32 %v600_v19, %v331_v20  ;;  %605 = vrsqrt.f32 %v329_v21  ;;  %v399_v27 = vsel %vm398_vm7, %v598_v63, %v395_v24  ;;  %vm358_vm13 = vmor %vm356_vm12, %vm357_vm9  ;;  %vm406_vm3 = vweird.f32 %v329_v21 }
 0x120   : > { %v352_v28 = vmul.f32 %v602_v11, %v351_v26  ;;  %v416_v29 = vmul.f32 %v399_v27, %v759_v57 }
 0x121   : > { %v333_v30 = vmul.f32 0.5, %v332_v48 }
 0x122   : > { %v353_v31 = vmul.f32 0.5, %v352_v28  ;;  %v295_v34 = vpop.xlane.xlu1 %294  ;;  %570 = vmatmul.msk.f32.vlgmr.msra.gmra.mxu3 %vm193_vm1, %v416_v29 }
 0x123   : > { %v334_v18 = vsub.f32 1.5, %v333_v30  ;;  %v315_v25 = vmul.f32 0.0625, %v295_v34 }
 0x124   : > { %v604_v36 = vpop.eup %603  ;;  %v354_v37 = vsub.f32 1.5, %v353_v31 }
 0x125   : > { %v606_v38 = vpop.eup %605  ;;  %v381_v39 = vmul.f32 %v604_v36, %v327_v3  ;;  %v323_v40 = vadd.f32 1e-05, %v315_v25  ;;  %v335_v41 = vmul.f32 %v600_v19, %v334_v18  ;;  %vm387_vm14 = vweird.f32 %v604_v36 }
 0x126   : > { %v401_v43 = vmul.f32 %v606_v38, %v329_v21  ;;  %v355_v57 = vmul.f32 %v602_v11, %v354_v37  ;;  %vm407_vm15 = vweird.f32 %v606_v38  ;;  %vm388_vm2 = vmor %vm386_vm0, %vm387_vm14 }
 0x127   : > { %v382_v32 = vmul.f32 %v604_v36, %v381_v39  ;;  %607 = vrsqrt.f32 %v323_v40  ;;  %v339_v44 = vsel %vm338_vm11, %v600_v19, %v335_v41  ;;  %vm408_vm4 = vmor %vm406_vm3, %vm407_vm15  ;;  %vm346_vm6 = vweird.f32 %v323_v40 }
 0x128   : > { %v402_v1 = vmul.f32 %v606_v38, %v401_v43  ;;  %v410_v33 = vmul.f32 %v339_v44, %v769_v7  ;;  %v359_v45 = vsel %vm358_vm13, %v602_v11, %v355_v57 }
 0x129   : > { %v383_v46 = vmul.f32 0.5, %v382_v32  ;;  %v301_v47 = vpop.xlane.xlu2 %300  ;;  %v412_v49 = vmul.f32 %v359_v45, %v772_v8 }
 0x12a   : > { %v403_v50 = vmul.f32 0.5, %v402_v1  ;;  %v317_v51 = vmul.f32 0.0625, %v301_v47  ;;  %564 = vmatmul.msk.f32.vlgmr.msra.gmra.mxu0 %vm193_vm1, %v410_v33 }
 0x12b   : > { %v384_v52 = vsub.f32 1.5, %v383_v46  ;;  %566 = vmatmul.msk.f32.vlgmr.msra.gmra.mxu1 %vm193_vm1, %v412_v49 }
 0x12c   : > { %v404_v53 = vsub.f32 1.5, %v403_v50  ;;  %v325_v54 = vadd.f32 1e-05, %v317_v51 }
 0x12d   : > { %v608_v55 = vpop.eup %607  ;;  %v385_v56 = vmul.f32 %v604_v36, %v384_v52 }
 0x12e   : > { %v341_v7 = vmul.f32 %v608_v55, %v323_v40  ;;  %609 = vrsqrt.f32 %v325_v54  ;;  %v405_v8 = vmul.f32 %v606_v38, %v404_v53  ;;  %vm347_vm5 = vweird.f32 %v608_v55 }
 0x12f   : > { %v389_v58 = vsel %vm388_vm2, %v604_v36, %v385_v56  ;;  %vm348_vm7 = vmor %vm346_vm6, %vm347_vm5  ;;  %vm366_vm9 = vweird.f32 %v325_v54 }
 0x130   : > { %v342_v59 = vmul.f32 %v608_v55, %v341_v7  ;;  %v415_v60 = vmul.f32 %v389_v58, %v785_v22  ;;  %v409_v61 = vsel %vm408_vm4, %v606_v38, %v405_v8 }
 0x131   : > { %v417_v63 = vmul.f32 %v409_v61, %v788_v23 }
 0x132   : > { %v343_v62 = vmul.f32 0.5, %v342_v59  ;;  %569 = vmatmul.msk.f32.gmra.mxu2 %vm193_vm1, %v415_v60 }
 0x133   : > { %571 = vmatmul.msk.f32.gmra.mxu3 %vm193_vm1, %v417_v63 }
 0x134   : > { %v610_v0 = vpop.eup %609  ;;  %v344_v2 = vsub.f32 1.5, %v343_v62 }
 0x135   : > { %v361_v4 = vmul.f32 %v610_v0, %v325_v54  ;;  %vm367_vm8 = vweird.f32 %v610_v0 }
 0x136   : > { %v345_v5 = vmul.f32 %v608_v55, %v344_v2  ;;  %vm368_vm10 = vmor %vm366_vm9, %vm367_vm8 }
 0x137   : > { %v362_v6 = vmul.f32 %v610_v0, %v361_v4 }
 0x138   : > { %v349_v9 = vsel %vm348_vm7, %v608_v55, %v345_v5 }
 0x139   : > { %v363_v10 = vmul.f32 0.5, %v362_v6  ;;  %v411_v22 = vmul.f32 %v349_v9, %v799_v35 }
 0x13b   : > { %v364_v12 = vsub.f32 1.5, %v363_v10  ;;  %565 = vmatmul.msk.f32.gmra.mxu0 %vm193_vm1, %v411_v22 }
 0x13d   : > { %v365_v23 = vmul.f32 %v610_v0, %v364_v12 }
 0x13f   : > { %v369_v13 = vsel %vm368_vm10, %v610_v0, %v365_v23 }
 0x140   : > { %v413_v14 = vmul.f32 %v369_v13, %v807_v42 }
 0x142   : > { %567 = vmatmul.msk.f32.gmra.mxu1 %vm193_vm1, %v413_v14 }
 0x19d   : > { %v479_v35 = vpop.f32.mrf.mxu2 }
 0x19e   : > { %v480_v16 = vadd.f32 %v594_v15, %v479_v35 }
 0x1a0   : > { %495 = vst [vmem:[%s172_s4 + $0x20] sm:$0xff] %v480_v16 }
 0x1a5   : > { %v485_v17 = vpop.f32.mrf.mxu3 }
 0x1a6   : > { %v486_v19 = vadd.f32 %v594_v15, %v485_v17 }
 0x1a7   : > { %v467_v3 = vpop.f32.mrf.mxu0 }
 0x1a8   : > { %497 = vst [vmem:[%s172_s4 + $0x30] sm:$0xff] %v486_v19  ;;  %v468_v11 = vadd.f32 %v594_v15, %v467_v3  ;;  %v473_v42 = vpop.f32.mrf.mxu1 }
 0x1a9   : > { %v474_v20 = vadd.f32 %v594_v15, %v473_v42 }
 0x1aa   : > { %491 = vst [vmem:[%s172_s4] sm:$0xff] %v468_v11 }
 0x1ab   : > { %493 = vst [vmem:[%s172_s4 + $0x10] sm:$0xff] %v474_v20 }
 0x1b5   : > { %v482_v21 = vpop.f32.mrf.mxu2 }
 0x1b6   : > { %v483_v24 = vadd.f32 %v594_v15, %v482_v21  ;;  %v488_v26 = vpop.f32.mrf.mxu3 }
 0x1b7   : > { %v489_v48 = vadd.f32 %v594_v15, %v488_v26 }
 0x1b8   : > { %496 = vst [vmem:[%s172_s4 + $0x28] sm:$0xff] %v483_v24  ;;  %v470_v27 = vpop.f32.mrf.mxu0 }
 0x1b9   : > { %v471_v28 = vadd.f32 %v594_v15, %v470_v27  ;;  %498 = vst [vmem:[%s172_s4 + $0x38] sm:$0xff] %v489_v48 }
 0x1bb   : > { %492 = vst [vmem:[%s172_s4 + $0x8] sm:$0xff] %v471_v28 }
 0x1bf   : > { %v476_v29 = vpop.f32.mrf.mxu1 }
 0x1c0   : > { %v477_v30 = vadd.f32 %v594_v15, %v476_v29 }
 0x1c2   : > { %494 = vst [vmem:[%s172_s4 + $0x18] sm:$0xff] %v477_v30 }
 0x1c3 PF: > { %s13_s12 = sadd.s32 1, %s617_s12  }
 0x1c4   : > { %p10_p4 = scmp.ge.s32.totalorder %s13_s12, 4  }
 0x1c6   :  { %12 = sbr.rel (!%p10_p4) target bundleno = 1 (0x1), region = 62 }

</bundles_post_ra>
